<compile_context>
chip_gen: v7x
topology: tpu7x:2x2x1
jax: 0.10.0
libtpu: 0.0.40
codegen_flags: <defaults>
</compile_context>

<pallas_src>
import math

import jax
import jax.numpy as jnp
from jax import lax
from jax.experimental import pallas as pl
from jax.experimental.pallas import tpu as pltpu


def _round_up(n: int, m: int) -> int:
    return ((n + m - 1) // m) * m


def _cdiv(a: int, b: int) -> int:
    return (a + b - 1) // b


def make_sinusoidal_table(num_embeddings: int, embedding_dim: int) -> jnp.ndarray:
    """Buffer setup mirroring PositionalEmbedding.__init__ (plain-JAX glue)."""
    assert embedding_dim % 2 == 0, "embedding_dim must be even"
    position = jnp.arange(num_embeddings, dtype=jnp.float32)[:, None]        # (V, 1)
    div_term = jnp.exp(
        jnp.arange(0, embedding_dim, 2, dtype=jnp.float32)
        * (-math.log(10000.0) / embedding_dim)
    )                                                                         # (D/2,)
    angles = position * div_term                                              # (V, D/2)
    pe = jnp.zeros((num_embeddings, embedding_dim), dtype=jnp.float32)
    pe = pe.at[:, 0::2].set(jnp.sin(angles))
    pe = pe.at[:, 1::2].set(jnp.cos(angles))
    return pe


def _gather_kernel(idx_ref, pe_ref, out_ref):
    """Row gather: out[r, :] = pe[idx[base + r], :] for r in [0, tile).

    idx_ref : SMEM (N_pad,) int32 -- scalar-prefetched index array (whole).
    pe_ref  : VMEM (V, D)         -- full table, resident, single buffer.
    out_ref : VMEM (tile, D)      -- output block for this grid step.
    """
    tile = out_ref.shape[0]
    base = pl.program_id(0) * tile

    def body(r, carry):
        v = idx_ref[base + r]                                   # SMEM scalar read
        out_ref[pl.ds(r, 1), :] = pe_ref[pl.ds(v, 1), :]        # (1, D) row copy
        return carry

    lax.fori_loop(0, tile, body, 0)


def positional_embedding_forward(
    x: jnp.ndarray,
    pe: jnp.ndarray,
    *,
    assume_contiguous_positions: bool = False,
    tile: int | None = None,
) -> jnp.ndarray:
    """Pallas equivalent of `self.pe[x]` (row gather from the embedding table).

    Index semantics: negative indices wrap (PyTorch-style); anything still out
    of range is clamped (jnp.take-style) instead of raising.
    """
    V, D = pe.shape
    out_shape = x.shape + (D,)

    if assume_contiguous_positions:
        # Fast path: x is assumed to be arange(S) broadcast over leading dims
        # (the normal positional-embedding case) -> one contiguous slice of pe.
        S = x.shape[-1]
        lead = (1,) * (len(x.shape) - 1)
        return jnp.broadcast_to(pe[:S].reshape(lead + (S, D)), out_shape)

    flat = x.reshape(-1).astype(jnp.int32)
    # Wrap negatives like PyTorch indexing, then clamp so the kernel never
    # reads out of bounds in VMEM (OOB VMEM reads are unchecked on TPU).
    flat = jnp.where(flat < 0, flat + V, flat)
    flat = jnp.clip(flat, 0, V - 1)
    N = flat.shape[0]

    # Rows gathered per grid step: big (amortizes ~0.35us/step overhead),
    # sublane-aligned, and chosen so the grid has >= 2 tiles when possible
    # (lets v7x's two TensorCores split the "parallel" axis).
    if tile is None:
        tile = min(1024, max(8, _round_up(_cdiv(N, 2), 8)))
    tile = max(8, _round_up(tile, 8))
    n_tiles = _cdiv(N, tile)
    n_pad = n_tiles * tile
    if n_pad != N:
        flat = jnp.pad(flat, (0, n_pad - N))        # pad rows (index 0) discarded

    itemsize = jnp.dtype(pe.dtype).itemsize
    table_bytes = V * D * itemsize                  # resident, single-buffered
    out_bytes = 2 * tile * D * itemsize             # double-buffered output block
    vmem_limit = max(16 << 20, min(table_bytes + out_bytes + (4 << 20), 100 << 20))

    out = pl.pallas_call(
        _gather_kernel,
        out_shape=jax.ShapeDtypeStruct((n_pad, D), pe.dtype),
        grid_spec=pltpu.PrefetchScalarGridSpec(
            # Indices land in SMEM before the grid runs (cheap scalar reads,
            # no lane-sparse VMEM index blocks).
            num_scalar_prefetch=1,
            grid=(n_tiles,),
            in_specs=[
                # Whole pe table resident in VMEM, single buffer (no blocking,
                # no double-buffered pipeline for a never-changing block).
                pl.BlockSpec(memory_space=pltpu.MemorySpace.VMEM),
            ],
            out_specs=pl.BlockSpec((tile, D), lambda i, idx: (i, 0)),
        ),
        compiler_params=pltpu.CompilerParams(
            dimension_semantics=("parallel",),
            vmem_limit_bytes=vmem_limit,
        ),
        cost_estimate=pl.CostEstimate(
            flops=0,
            transcendentals=0,
            bytes_accessed=table_bytes + n_pad * 4 + n_pad * D * itemsize,
        ),
    )(flat, pe)

    return out[:N].reshape(out_shape)


if __name__ == "__main__":
    num_embeddings = 64
    embedding_dim = 32

    key = jax.random.PRNGKey(0)
    # x: integer index tensor (e.g. token positions), shape (batch=2, seq=8)
    x = jax.random.randint(
        key, (2, 8), minval=0, maxval=num_embeddings, dtype=jnp.int32
    )

    pe = make_sinusoidal_table(num_embeddings, embedding_dim)

    # Gather-kernel path (arbitrary indices).
    y = positional_embedding_forward(x, pe)
    y = jax.block_until_ready(y)
    ref = jnp.take(pe, x, axis=0)
    assert y.shape == x.shape + (embedding_dim,)
    assert y.dtype == pe.dtype
    assert bool(jnp.allclose(y, ref)), "mismatch vs reference gather"

    # Fast path for the canonical positional case x == arange(S) per sequence.
    xa = jnp.broadcast_to(jnp.arange(8, dtype=jnp.int32), (2, 8))
    ya = positional_embedding_forward(xa, pe, assume_contiguous_positions=True)
    ya = jax.block_until_ready(ya)
    assert bool(jnp.allclose(ya, jnp.take(pe, xa, axis=0))), "mismatch on arange fast path"

    print("KERNEL_OK")
</pallas_src>

<mosaic_0001>
module attributes {stable_mosaic.version = 11 : i64} {
  func.func @_gather_kernel(%arg0: i32, %arg1: memref<16xi32, #tpu.memory_space<smem>>, %arg2: memref<64x32xf32, #tpu.memory_space<vmem>>, %arg3: memref<8x32xf32, #tpu.memory_space<vmem>>) attributes {dimension_semantics = [#tpu.dimension_semantics<parallel>], iteration_bounds = array<i64: 2>, scalar_prefetch = 1 : i64, scratch_operands = 0 : i64, tpu.core_type = #tpu.core_type<tc>, window_params = [{pipeline_mode = #tpu.pipeline_mode<synchronous>, transform_indices = @transform_0, window_bounds = array<i64: 64, 32>}, {transform_indices = @transform_1, window_bounds = array<i64: 8, 32>}]} {
    %c8_i32 = arith.constant 8 : i32
    %0 = arith.muli %arg0, %c8_i32 : i32
    %c0_i32 = arith.constant 0 : i32
    %c8_i32_0 = arith.constant 8 : i32
    %1 = arith.addi %c0_i32, %c8_i32_0 : i32
    %c1_i32 = arith.constant 1 : i32
    scf.for %arg4 = %c0_i32 to %1 step %c1_i32  : i32 {
      %2 = arith.addi %0, %arg4 : i32
      %3 = arith.index_cast %2 : i32 to index
      %4 = memref.load %arg1[%3] : memref<16xi32, #tpu.memory_space<smem>>
      %5 = arith.index_cast %4 : i32 to index
      %c0 = arith.constant 0 : index
      %6 = vector.load %arg2[%5, %c0] : memref<64x32xf32, #tpu.memory_space<vmem>>, vector<1x32xf32>
      %7 = arith.index_cast %arg4 : i32 to index
      %c0_2 = arith.constant 0 : index
      %8 = vector.load %arg3[%7, %c0_2] : memref<8x32xf32, #tpu.memory_space<vmem>>, vector<1x32xf32>
      tpu.vector_store %arg3[%7, %c0_2], %6 {strides = array<i32>} : memref<8x32xf32, #tpu.memory_space<vmem>>, vector<1x32xf32>,
    }
    %c8_i32_1 = arith.constant 8 : i32
    return
  }
  func.func @transform_0(%arg0: i32, %arg1: memref<16xi32, #tpu.memory_space<smem>>) -> (i32, i32) {
    %c0_i32 = arith.constant 0 : i32
    %c0_i32_0 = arith.constant 0 : i32
    %c0_i32_1 = arith.constant 0 : i32
    return %c0_i32, %c0_i32_0 : i32, i32
  }
  func.func @transform_1(%arg0: i32, %arg1: memref<16xi32, #tpu.memory_space<smem>>) -> (i32, i32) {
    %c0_i32 = arith.constant 0 : i32
    %c0_i32_0 = arith.constant 0 : i32
    return %arg0, %c0_i32 : i32, i32
  }
}

</mosaic_0001>

<bundles_post_ra>
// kernel: tpu_custom_call.1
= control target key start
LH: loop header
LB: loop body
LE: loop exit
PB: predicated region body
PF: predicated region fallthrough
CT: control target
= control target key end

     0   :  { %s440_s0 = inlined_call_operand.vmem [shape: s32[16], index: 0, kind: input, shape index: {}]   ;;  %s441_s1 = inlined_call_operand.vmem [shape: f32[64,32], index: 1, kind: input, shape index: {}]   ;;  %s442_s2 = inlined_call_operand.hbm [shape: f32[16,32], index: 2, kind: output, shape index: {}]  }
   0x1   :  { %s7_s11 = sshll.u32 %s440_s0, 4  ;;  %s8_s11 = int_to_ptr.vmem [resolvable:$true] %s7_s11 }
   0x2   :  { %s241_s12 = scalar_lea.vmem %s8_s11, 16  ;;  %p246_p1 = scmp.lt.s32.totalorder %s8_s11, %s8_s11 }
   0x3   :  { %p242_p0 = scmp.ne.s32.totalorder %s8_s11, %s241_s12  ;;  %p247_p2 = scmp.lt.s32.totalorder %s241_s12, %s241_s12 }
   0x5   :  { %p248_p3 = por %p247_p2, %p246_p1 }
   0x7   :  { %p249_p4 = pnand %p248_p3, %p242_p0 }
   0x9   :  { %252 = shalt.err (!%p249_p4)  }
   0xa   :  { %s327_s13 = smov [#allocation3]  }
   0xb   :  { %10 = dma.vmem_to_smem %s8_s11, 16, %s327_s13, [#allocation2] }
   0xc   :  { %301 = dma.done.wait [#allocation2], 16 }
   0xd   :  { %302 = vsyncadd [#allocation2], 4294967280 }
   0xe   :  { %12 = sfence }
   0xf   :  { %13 = vsyncpa [#allocation5], 0 }
  0x10   :  { %15 = vsyncpa [#allocation5 + $0x1], 0  ;;  %s347_s14 = smov 0   ;;  %s349_s15 = smov 0  }
  0x11   :  { %s351_s0 = smov 0   ;;  %s353_s16 = smov 0  }
  0x12 LB: > { %s368_s17 = sadd.s32 4294967295, %s321_s16   ;;  %s184_s18 = sadd.s32 4294967294, %s321_s16   ;;  %s321_s16 = sphi %s353_s16, %s448_s16   ;;  %s317_s0 = sphi %s351_s0, %s447_s0   ;;  %s313_s15 = sphi %s349_s15, %s446_s15   ;;  %s309_s14 = sphi %s347_s14, %s445_s14  }
  0x13   : > { %s372_s19 = sadd.s32 1, %s321_s16   ;;  %s49_s20 = sadd.s32 1, %s317_s0 }
  0x14   : > { %s46_s21 = ssub.s32 %s321_s16, %s372_s19  ;;  %p59_p5 = scmp.ne.s32.totalorder %s317_s0, %s313_s15 }
  0x15   : > { %p47_p6 = scmp.eq.s32.totalorder %s46_s21, 0  ;;  %p60_p7 = scmp.eq.s32.totalorder %s368_s17, 1 }
  0x16   : > { %p65_p8 = scmp.ne.s32.totalorder %s313_s15, %s309_s14  ;;  %p66_p9 = scmp.eq.s32.totalorder %s184_s18, 1 }
  0x17   : > { %s383_s22 = scalar_select %p47_p6, %s317_s0, %s49_s20  }
  0x18   : > { %p385_p10 = por %p60_p7, %p59_p5  ;;  %p389_p11 = por %p66_p9, %p65_p8 }
  0x19   : > { %p186_p12 = scmp.ge.s32.totalorder %s321_s16, 1  ;;  %p87_p13 = scmp.lt.s32.totalorder %s321_s16, 3 }
  0x1b   : > { %p88_p0 = pnand %p186_p12, %p87_p13 }
  0x1c   : > { %s99_s25 = sand.u32 (!%p88_p0), 1, %s313_s15   ;;  %s188_s26 = sshll.u32 (!%p88_p0), %s368_s17, 3 }
  0x1d   : > { %91 = sbr.rel (%p88_p0) target bundleno = 64 (0x40), region = 24  ;;  %s187_s27 = sshll.u32 (!%p88_p0), %s99_s25, 3 }
  0x1e   : > { %s101_s28 = scalar_lea.vmem (!%p88_p0), [#allocation4], %s187_s27  ;;  %s323_s29 = smov (!%p88_p0), 0  }
  0x24 LB: >> { %s109_s30 = sadd.s32 %s325_s29, %s188_s26  ;;  %s113_s4 = scalar_lea.vmem %s101_s28, %s325_s29 [#allocation4]  ;;  %vm114_vm0 = vcmask 253952   ;;  %s325_s29 = sphi %s323_s29, %s108_s29  }
  0x25   : >> { %s110_s3 = sld [smem:[#allocation3 + %s109_s30]]  ;;  %s108_s29 = sadd.s32 1, %s325_s29  }
  0x26   : >> { %p105_p1 = scmp.ge.s32.totalorder %s108_s29, 8  }
  0x27   : > { %s190_s8 = sshll.u32 (%p105_p1), %s368_s17, 7  ;;  %s130_s12 = sshll.u32 (%p105_p1), %s101_s28, 4  ;;  %s131_s12 = int_to_ptr.vmem [resolvable:$true] %s130_s12 }
  0x28   : > { %107 = sbr.rel (!%p105_p1) target bundleno = 36 (0x24), region = 65  ;;  %s404_s11 = scalar_lea.hbm (%p105_p1), %s442_s2, %s190_s8 }
  0x29   : > { %s117_s13 = scalar_lea.sflag (%p105_p1), [#allocation5], %s99_s25  ;;  %s253_s18 = scalar_lea.vmem (%p105_p1), %s131_s12, 128 }
  0x2a   : > { %p254_p2 = scmp.ne.s32.totalorder (%p105_p1), %s131_s12, %s253_s18  ;;  %s328_s20 = smov (%p105_p1), [#allocation4]  }
  0x2b   : >> { %s111_s7 = scalar_lea.vmem %s441_s1, %s110_s3  ;;  %s257_s21 = sshll.u32 (%p105_p1), %s328_s20, 4  ;;  %s258_s21 = int_to_ptr.vmem [resolvable:$false] %s257_s21 }
  0x2c   : >> { %v112_v0 = vld [vmem:[%s111_s7] sm:$0x1]  ;;  %p255_p3 = pnand (%p105_p1), %p254_p2, %p385_p10  ;;  %s259_s27 = scalar_lea.vmem (%p105_p1), %s258_s21, 256 }
  0x2d   : >> { %115 = vst.msk [vmem:[%s113_s4] sm:$0x1] %vm114_vm0, %v112_v0  ;;  %p260_p5 = scmp.lt.s32.totalorder (%p105_p1), %s131_s12, %s258_s21  ;;  %p261_p6 = scmp.lt.s32.totalorder (%p105_p1), %s259_s27, %s253_s18 }
  0x2e   : > { %p256_p4 = pneg (%p105_p1), %p255_p3 }
  0x2f   : > { %p262_p7 = por %p261_p6, %p260_p5 }
  0x31   : > { %p263_p8 = pnand %p262_p7, %p256_p4 }
  0x33   : > { %266 = shalt.err (!%p263_p8)
}
  0x34   : > { %s267_s17 = scalar_lea.hbm %s404_s11, 128  ;;  %s271_s28 = scalar_lea.hbm %s442_s2, 256 }
  0x35   : > { %p268_p9 = scmp.ne.s32.totalorder %s404_s11, %s267_s17  ;;  %p272_p0 = scmp.lt.u32.totalorder %s404_s11, %s442_s2 }
  0x36   : > { %p273_p1 = scmp.lt.u32.totalorder %s271_s28, %s267_s17  ;;  %p275_p3 = scmp.lt.u32.totalorder %s267_s17, %s404_s11 }
  0x37   : > { %p269_p12 = pnand %p268_p9, %p385_p10 }
  0x38   : > { %p274_p2 = por %p273_p1, %p272_p0 }
  0x39   : > { %p270_p13 = pneg %p269_p12 }
  0x3a   : > { %p276_p4 = por %p275_p3, %p274_p2 }
  0x3c   : > { %p277_p5 = pnand %p276_p4, %p270_p13 }
  0x3e   : > { %280 = shalt.err (!%p277_p5)
}
  0x3f   : > { %193 = dma.vmem_to_hbm [thread:$0]  (%p385_p10), %s131_s12, 128, %s404_s11, %s117_s13  }
  0x40 PF: > { %p199_p6 = scmp.ge.s32.totalorder %s321_s16, 2  ;;  %s142_s3 = sand.u32 1, %s309_s14  }
  0x41   : > { %s143_s4 = scalar_lea.sflag [#allocation5], %s142_s3 }
  0x42   : > { %p196_p7 = pnand %p199_p6, %p389_p11 }
  0x44   : > { %304 = dma.done.wait (!%p196_p7), %s143_s4, 128  }
  0x45   : > { %306 = vsyncadd (!%p196_p7), %s143_s4, 4294967168  ;;  %p18_p8 = scmp.ge.s32.totalorder %s372_s19, 4   ;;  %s445_s14 = smov %s313_s15 }
  0x46   : > { %s446_s15 = smov %s317_s0  ;;  %s447_s0 = smov %s383_s22 }
  0x47   : > { %s448_s16 = smov %s372_s19  ;;  %20 = sbr.rel (!%p18_p8) target bundleno = 18 (0x12), region = 76 }
  0x4e   :  { %148 = vsyncpa [#allocation5], 1 }
  0x4f   :  { %150 = vsyncpa [#allocation5 + $0x1], 1 }

</bundles_post_ra>
